<compile_context>
chip_gen: v7x
topology: tpu7x:2x2x1
jax: 0.10.0
libtpu: 0.0.40
codegen_flags: <defaults>
</compile_context>

<pallas_src>
import functools

import jax
import jax.numpy as jnp
from jax import lax
from jax.experimental import pallas as pl
from jax.experimental.pallas import tpu as pltpu

_EPS = 1e-9
_LANE = 128
_VMEM_LIMIT_BYTES = 48 * 1024 * 1024     # safe on v5e/v6e (128 MiB) and v7x (64 MiB)
_VMEM_BUDGET_BYTES = 20 * 1024 * 1024    # headroom target used when sizing Bt


def _pad_to(n, m):
    return ((n + m - 1) // m) * m


def _num_tensorcores():
    """2 TensorCores on v7x, 1 on v5e/v6e (best effort; default 1)."""
    try:
        kind = jax.devices()[0].device_kind.lower()
    except Exception:
        return 1
    return 2 if ("v7" in kind or "tpu7" in kind) else 1


def _batch_tile(batch, footprint_bytes, *, budget=_VMEM_BUDGET_BYTES, max_tile=32):
    """Largest Bt dividing `batch` whose estimated VMEM footprint fits `budget`.

    On single-TC chips prefer Bt = batch (one grid step, no per-step overhead);
    on 2-TC chips keep at least 2 "parallel" grid steps for megacore sharding.
    """
    bt = max(1, min(batch, max_tile))
    if _num_tensorcores() > 1 and batch > 1:
        bt = min(bt, max(1, batch // 2))
    while bt > 1 and (batch % bt != 0 or footprint_bytes(bt) > budget):
        bt -= 1
    return bt


# --------------------------------------------------------------------------
# Pallas kernels
# --------------------------------------------------------------------------

def _conv_squash_kernel(p_ref, wt_ref, b_ref, a_ref, at_ref, o_ref):
    """Fused im2col-conv + bias + capsule squash for one batch tile.

    p_ref:  (Bt*P, Q_pad)    im2col patches, bf16, rows ordered (batch, spatial)
    wt_ref: (Q_pad, C_pad)   flattened conv weight (transposed, zero-padded), bf16
    b_ref:  (1, C_pad)       conv bias (zero-padded), f32
    a_ref:  (Bt*P, n_grp)    thin 0/1 row -> capsule-group selector, f32
    at_ref: (n_grp, Bt*P)    its transpose
    o_ref:  (Bt*P, C_pad)    squashed capsule elements (lane-dense, f32)
    """
    s = jnp.dot(p_ref[...], wt_ref[...],
                preferred_element_type=jnp.float32) + b_ref[...]
    ssq = s * s
    # per-capsule sum of squares: factored A @ (A.T @ s^2) instead of a dense
    # block-diagonal matmul (D/2x fewer MXU FLOPs, linear-size helper).
    grp = jnp.dot(at_ref[...], ssq, preferred_element_type=jnp.float32)
    msq = jnp.dot(a_ref[...], grp, preferred_element_type=jnp.float32)
    # squash: v = s * |s| / (1 + |s|^2)   (EUP rsqrt + approx recip)
    scale = msq * lax.rsqrt(msq + _EPS) * pl.reciprocal(1.0 + msq, approx=True)
    o_ref[...] = s * scale


def _fc_routing_kernel(x_ref, w_ref, bias_ref, g_ref, gt_ref, s_ref, st_ref,
                       o_ref, u_ref, *, bt, n_in, k_in, num_out, routing_iters):
    """Dynamic routing for a tile of `bt` batch elements.

    x_ref:    (bt, N_in, K)     input capsules, f32
    w_ref:    (K, N_in, M_pad)  transformation weights, bf16 (M_pad = pad(J*D,128))
    bias_ref: (1, M_pad)        routing bias, f32
    g_ref:    (M_pad, J)        0/1 lane -> output-capsule membership, f32
    gt_ref:   (J, M_pad)        transpose of g_ref, bf16
    s_ref:    (bt, bt*N_in)     0/1 per-batch segment-sum selector, bf16
    st_ref:   (bt*N_in, bt)     transpose of s_ref, f32
    o_ref:    (bt, M_pad)       output capsules v_J (padded lanes are zero), f32
    u_ref:    (bt*N_in, M_pad)  bf16 VMEM scratch for u_hat
    """
    m_pad = o_ref.shape[-1]
    bias = bias_ref[...]
    G = g_ref[...]

    # u_hat[(b,i), m] = sum_k W[k, i, m] * x[b, i, k]; streamed per-b into the
    # bf16 scratch (no concatenate, no long-lived per-b slabs).
    for b in range(bt):
        xb = x_ref[b]                                  # [N_in, K]
        ub = w_ref[0] * xb[:, 0:1]                     # bf16 * f32 -> f32
        for k in range(1, k_in):                       # k_in small & static
            ub = ub + w_ref[k] * xb[:, k:k + 1]
        u_ref[pl.ds(b * n_in, n_in), :] = ub.astype(u_ref.dtype)

    b_ij = jnp.zeros((bt * n_in, num_out), jnp.float32)
    v = jnp.zeros((bt, m_pad), jnp.float32)
    for r in range(routing_iters):
        # softmax over output capsules -- exact divide so coupling coeffs sum to 1
        bmax = jnp.max(b_ij, axis=-1, keepdims=True)
        e = jnp.exp(b_ij - bmax)
        c = (e / jnp.sum(e, axis=-1, keepdims=True)).astype(jnp.bfloat16)
        c_rep = jnp.dot(c, gt_ref[...])                               # bf16 [bt*N, M_pad]
        # per-batch weighted sum over input capsules (bf16 MXU, f32 accumulate)
        s = jnp.dot(s_ref[...], c_rep * u_ref[...],
                    preferred_element_type=jnp.float32) + bias        # [bt, M_pad]
        # squash per output capsule (group sum over its D lanes)
        msq_j = jnp.dot(s * s, G, preferred_element_type=jnp.float32)            # [bt, J]
        msq = jnp.dot(msq_j, gt_ref[...], preferred_element_type=jnp.float32)    # [bt, M_pad]
        v = s * (msq * lax.rsqrt(msq + _EPS)
                 * pl.reciprocal(1.0 + msq, approx=True))
        if r != routing_iters - 1:
            v_rows = jnp.dot(st_ref[...], v, preferred_element_type=jnp.float32)  # [bt*N, M_pad]
            agree = jnp.dot(u_ref[...] * v_rows, G,
                            preferred_element_type=jnp.float32)                   # [bt*N, J]
            b_ij = b_ij + agree
    o_ref[...] = v


# --------------------------------------------------------------------------
# Wrappers (layout plumbing in plain JAX, hot path in Pallas)
# --------------------------------------------------------------------------

def conv_caps_forward(x, conv_w, conv_b, *, stride, vec_len_out):
    """CONV capsule layer: Conv2d(k=9, stride) -> view(B,-1,D,1) -> squash(dim=-2)."""
    B, C, H, W_ = x.shape
    C_out, _, KH, KW = conv_w.shape
    Ho = (H - KH) // stride + 1
    Wo = (W_ - KW) // stride + 1
    P = Ho * Wo
    Q = C * KH * KW
    D = vec_len_out
    # TODO(synk): capsule groups that cross conv-channel boundaries (P % D != 0,
    # as in the canonical 6x6/len-8 CapsNet) need a per-batch flatten inside the
    # kernel; the grouped squash below assumes P % D == 0.
    assert P % D == 0, "fused conv+squash kernel requires P % vec_len_out == 0"

    Q_pad = _pad_to(Q, _LANE)
    C_pad = _pad_to(C_out, _LANE)

    # im2col via two gathers: rows ordered (b, oh, ow), cols ordered (c, kh, kw)
    # to match the OIHW weight flatten; zero-pad Q to a lane multiple; bf16 cast
    # halves the dominant HBM traffic of this branch.
    # TODO(synk): assemble patches in-kernel (strided pl.ds over row-bands of x)
    # to avoid materializing the ~KH*KW/stride^2 im2col expansion in HBM (v5e).
    rows = (jnp.arange(Ho) * stride)[:, None] + jnp.arange(KH)[None, :]   # [Ho, KH]
    cols = (jnp.arange(Wo) * stride)[:, None] + jnp.arange(KW)[None, :]   # [Wo, KW]
    pat = x[:, :, rows][:, :, :, :, cols]               # [B, C, Ho, KH, Wo, KW]
    pat = pat.transpose(0, 2, 4, 1, 3, 5).reshape(B * P, Q)
    pat = jnp.pad(pat, ((0, 0), (0, Q_pad - Q))).astype(jnp.bfloat16)

    wT = jnp.pad(conv_w.reshape(C_out, Q).T,
                 ((0, Q_pad - Q), (0, C_pad - C_out))).astype(jnp.bfloat16)
    b2 = jnp.pad(conv_b.reshape(1, C_out),
                 ((0, 0), (0, C_pad - C_out))).astype(jnp.float32)

    def footprint(bt):
        tile = bt * P
        return (tile * Q_pad * 2 * 2            # pat tile (bf16, double-buffered)
                + tile * C_pad * 4 * 2          # out tile (f32, double-buffered)
                + tile * C_pad * 4 * 3          # s / s^2 / msq temporaries
                + Q_pad * C_pad * 2 * 2         # weights (worst case double-buffered)
                + C_pad * 4 * 2                 # bias
                + 2 * tile * (tile // D) * 4 * 2)   # A + AT selectors
    Bt = _batch_tile(B, footprint)

    # Thin 0/1 selector: row r -> capsule group (same batch, same channel column,
    # same run of D consecutive spatial positions).
    ngroups = (Bt * P) // D
    r_idx = jnp.arange(Bt * P)
    grp_id = (r_idx // P) * (P // D) + (r_idx % P) // D
    A = (grp_id[:, None] == jnp.arange(ngroups)[None, :]).astype(jnp.float32)
    AT = A.T

    def run(single_buffer):
        def cspec(shape):
            n = len(shape)
            zeros = lambda i: (0,) * n
            if single_buffer:
                return pl.BlockSpec(shape, zeros, pipeline_mode=pl.Buffered(1))
            return pl.BlockSpec(shape, zeros)
        return pl.pallas_call(
            _conv_squash_kernel,
            out_shape=jax.ShapeDtypeStruct((B * P, C_pad), jnp.float32),
            grid=(B // Bt,),
            in_specs=[pl.BlockSpec((Bt * P, Q_pad), lambda i: (i, 0)),
                      cspec((Q_pad, C_pad)),
                      cspec((1, C_pad)),
                      cspec((Bt * P, ngroups)),
                      cspec((ngroups, Bt * P))],
            out_specs=pl.BlockSpec((Bt * P, C_pad), lambda i: (i, 0)),
            compiler_params=pltpu.CompilerParams(
                dimension_semantics=("parallel",),
                vmem_limit_bytes=_VMEM_LIMIT_BYTES),
        )(pat, wT, b2, A, AT)

    try:
        out = run(True)       # grid-invariant operands single-buffered
    except Exception:         # pipeline_mode / Buffered(1) unsupported -> default
        out = run(False)

    out = out[:, :C_out]                                  # strip lane padding
    # PyTorch: capsules.view(B, -1, D, 1) on the NCHW conv output; the
    # reshape/transpose below is wrapper-side layout plumbing only.
    n_caps = (C_out * P) // D
    caps = out.reshape(B, P, C_out).transpose(0, 2, 1).reshape(B, n_caps, D, 1)
    return caps


def fc_caps_forward(x, W, bias, *, num_outputs, vec_len_in, vec_len_out,
                    routing_iters=3):
    """FC capsule layer with dynamic routing.  x: [B, N_in, vec_len_in, 1]."""
    B, N_in = x.shape[0], x.shape[1]
    J, D = num_outputs, vec_len_out
    K = vec_len_in
    M = J * D
    M_pad = _pad_to(M, _LANE)

    x2 = x.reshape(B, N_in, K).astype(jnp.float32)
    # TODO(synk): x2's K=vec_len_in lane dim is padded to 128 lanes in VMEM; the
    # padded footprint is charged in the Bt sizing below.  A lane-dense
    # [B, K, N_in] repack + one in-kernel transpose would shrink it ~32x.

    # torch param W: [1, N_in, M, K, 1] -> [K, N_in, M_pad] so per-k slabs are
    # contiguous lane-dense tiles; zero-pad M to a lane multiple.
    w_knm = jnp.transpose(W.reshape(N_in, M, K), (2, 0, 1))
    w_knm = jnp.pad(w_knm, ((0, 0), (0, 0), (0, M_pad - M))).astype(jnp.bfloat16)
    bias_flat = jnp.pad(bias.reshape(1, M),
                        ((0, 0), (0, M_pad - M))).astype(jnp.float32)

    # 0/1 helper matrices built once wrapper-side; padded lanes map to no capsule.
    G = (jnp.arange(M_pad)[:, None] // D == jnp.arange(J)[None, :]).astype(jnp.float32)
    GT = G.T.astype(jnp.bfloat16)

    def footprint(bt):
        per_batch = N_in * (_LANE * 4 * 2     # lane-padded x tile (double-buffered)
                            + M_pad * 2       # bf16 u_hat scratch
                            + 3 * M_pad * 4)  # routing-loop temporaries
        const = (K * N_in * M_pad * 2 * 2     # weights (worst case double-buffered)
                 + 2 * M_pad * J * 4          # G + GT
                 + M_pad * 4 * 2)             # bias
        sel = bt * bt * N_in * (2 + 4)        # S + ST
        out = bt * M_pad * 4 * 2
        return bt * per_batch + const + sel + out
    Bt = _batch_tile(B, footprint)

    seg = (jnp.arange(Bt)[:, None] == (jnp.arange(Bt * N_in)[None, :] // N_in))
    S = seg.astype(jnp.bfloat16)
    ST = seg.T.astype(jnp.float32)

    kernel = functools.partial(_fc_routing_kernel, bt=Bt, n_in=N_in, k_in=K,
                               num_out=J, routing_iters=routing_iters)

    def run(single_buffer):
        def cspec(shape):
            n = len(shape)
            zeros = lambda i: (0,) * n
            if single_buffer:
                return pl.BlockSpec(shape, zeros, pipeline_mode=pl.Buffered(1))
            return pl.BlockSpec(shape, zeros)
        return pl.pallas_call(
            kernel,
            out_shape=jax.ShapeDtypeStruct((B, M_pad), jnp.float32),
            grid=(B // Bt,),
            in_specs=[pl.BlockSpec((Bt, N_in, K), lambda i: (i, 0, 0)),
                      cspec((K, N_in, M_pad)),
                      cspec((1, M_pad)),
                      cspec((M_pad, J)),
                      cspec((J, M_pad)),
                      cspec((Bt, Bt * N_in)),
                      cspec((Bt * N_in, Bt))],
            out_specs=pl.BlockSpec((Bt, M_pad), lambda i: (i, 0)),
            scratch_shapes=[pltpu.VMEM((Bt * N_in, M_pad), jnp.bfloat16)],
            compiler_params=pltpu.CompilerParams(
                dimension_semantics=("parallel",),
                vmem_limit_bytes=_VMEM_LIMIT_BYTES),
        )(x2, w_knm, bias_flat, G, GT, S, ST)

    try:
        v = run(True)
    except Exception:
        v = run(False)

    v = v[:, :M].reshape(B, J, D)                         # strip lane padding
    return jnp.squeeze(v)                                 # matches torch .squeeze()


class CapsLayer:
    """JAX/Pallas port of the PyTorch CapsLayer module."""

    def __init__(self, num_inputs, num_outputs, vec_len_in, vec_len_out,
                 with_routing, layer_type='FC', *, key):
        self.num_outputs = num_outputs
        self.vec_len_in = vec_len_in
        self.vec_len_out = vec_len_out
        self.with_routing = with_routing
        self.layer_type = layer_type
        if self.layer_type == 'CONV' and (not self.with_routing):
            self.kernel_size, self.stride = 9, 2
            k1, k2 = jax.random.split(key)
            c_out = num_outputs * vec_len_out
            # deterministic synthetic init (not a checkpoint load)
            self.conv_w = 0.1 * jax.random.normal(
                k1, (c_out, num_inputs, self.kernel_size, self.kernel_size),
                jnp.float32)
            self.conv_b = 0.1 * jax.random.normal(k2, (c_out,), jnp.float32)
        if self.layer_type == 'FC' and self.with_routing:
            self.W = jax.random.normal(
                key, (1, num_inputs, num_outputs * vec_len_out, vec_len_in, 1),
                jnp.float32)
            self.bias = jnp.zeros((1, 1, num_outputs, vec_len_out, 1), jnp.float32)

    def forward(self, x):
        if self.layer_type == 'CONV' and (not self.with_routing):
            return conv_caps_forward(x, self.conv_w, self.conv_b,
                                     stride=self.stride,
                                     vec_len_out=self.vec_len_out)
        elif self.layer_type == 'FC' and self.with_routing:
            return fc_caps_forward(x, self.W, self.bias,
                                   num_outputs=self.num_outputs,
                                   vec_len_in=self.vec_len_in,
                                   vec_len_out=self.vec_len_out)
        else:
            raise ImportError('the layer type must be CONV or FC')


# --------------------------------------------------------------------------
# Plain-JAX references (mirror the PyTorch forward) for a sanity check
# --------------------------------------------------------------------------

def _squash_ref(x, axis=-2):
    msq = jnp.sum(x * x, axis=axis, keepdims=True)
    return msq / (1.0 + msq) * (x / jnp.sqrt(msq + _EPS))


def conv_caps_ref(x, w, b, stride, d_out):
    y = lax.conv_general_dilated(x, w, (stride, stride), 'VALID',
                                 dimension_numbers=('NCHW', 'OIHW', 'NCHW'))
    y = y + b[None, :, None, None]
    B = y.shape[0]
    caps = y.reshape(B, -1, d_out, 1)
    return _squash_ref(caps, axis=-2)


def fc_caps_ref(x, W, bias, J, d_out, iters=3):
    B, N_in = x.shape[0], x.shape[1]
    xr = x.reshape(B, N_in, 1, x.shape[2], 1)
    u_hat = jnp.sum(W * xr, axis=3, keepdims=True).reshape(B, N_in, J, d_out, 1)
    b_ij = jnp.zeros((B, N_in, J, 1, 1), jnp.float32)
    v = None
    for r in range(iters):
        c = jax.nn.softmax(b_ij, axis=2)
        s = jnp.sum(c * u_hat, axis=1, keepdims=True) + bias
        v = _squash_ref(s, axis=-2)
        if r != iters - 1:
            b_ij = b_ij + jnp.sum(u_hat * v, axis=3, keepdims=True)
    return jnp.squeeze(v)


# --------------------------------------------------------------------------
# Main
# --------------------------------------------------------------------------

if __name__ == "__main__":
    key = jax.random.PRNGKey(0)
    kx, kc, kf = jax.random.split(key, 3)

    # small, forward-consistent shapes
    B, C_in, H, W = 2, 4, 16, 16
    x = jax.random.normal(kx, (B, C_in, H, W), jnp.float32)

    # Primary capsules: CONV branch (no routing).
    primary = CapsLayer(num_inputs=C_in, num_outputs=8, vec_len_in=1,
                        vec_len_out=4, with_routing=False, layer_type='CONV',
                        key=kc)
    caps1 = primary.forward(x)                 # [2, 128, 4, 1]

    # Digit capsules: FC branch with dynamic routing.
    n_caps = caps1.shape[1]
    digit = CapsLayer(num_inputs=n_caps, num_outputs=10, vec_len_in=4,
                      vec_len_out=16, with_routing=True, layer_type='FC',
                      key=kf)
    caps2 = digit.forward(caps1)               # [2, 10, 16]

    caps1, caps2 = jax.block_until_ready((caps1, caps2))

    # sanity checks against the plain-JAX reference
    ref1 = conv_caps_ref(x, primary.conv_w, primary.conv_b, primary.stride, 4)
    ref2 = fc_caps_ref(caps1, digit.W, digit.bias, 10, 16)

    assert caps1.shape == (B, 128, 4, 1), caps1.shape
    assert caps2.shape == (B, 10, 16), caps2.shape
    assert bool(jnp.all(jnp.isfinite(caps1))) and bool(jnp.all(jnp.isfinite(caps2)))
    assert bool(jnp.allclose(caps1, ref1, atol=5e-2, rtol=5e-2))
    assert bool(jnp.allclose(caps2, ref2, atol=5e-2, rtol=5e-2))

    print("KERNEL_OK")
</pallas_src>

<mosaic_0001>
module attributes {stable_mosaic.version = 11 : i64} {
  func.func @_conv_squash_kernel(%arg0: i32, %arg1: memref<32x384xbf16, #tpu.memory_space<vmem>>, %arg2: memref<384x128xbf16, #tpu.memory_space<vmem>>, %arg3: memref<1x128xf32, #tpu.memory_space<vmem>>, %arg4: memref<32x8xf32, #tpu.memory_space<vmem>>, %arg5: memref<8x32xf32, #tpu.memory_space<vmem>>, %arg6: memref<32x128xf32, #tpu.memory_space<vmem>>) attributes {dimension_semantics = [#tpu.dimension_semantics<parallel>], iteration_bounds = array<i64: 1>, scalar_prefetch = 0 : i64, scratch_operands = 0 : i64, tpu.core_type = #tpu.core_type<tc>, window_params = [{transform_indices = @transform_0, window_bounds = array<i64: 32, 384>}, {pipeline_mode = #tpu.pipeline_mode<synchronous>, transform_indices = @transform_1, window_bounds = array<i64: 384, 128>}, {pipeline_mode = #tpu.pipeline_mode<synchronous>, transform_indices = @transform_2, window_bounds = array<i64: 1, 128>}, {pipeline_mode = #tpu.pipeline_mode<synchronous>, transform_indices = @transform_3, window_bounds = array<i64: 32, 8>}, {pipeline_mode = #tpu.pipeline_mode<synchronous>, transform_indices = @transform_4, window_bounds = array<i64: 8, 32>}, {transform_indices = @transform_5, window_bounds = array<i64: 32, 128>}]} {
    %c0 = arith.constant 0 : index
    %c0_0 = arith.constant 0 : index
    %0 = vector.load %arg1[%c0, %c0_0] : memref<32x384xbf16, #tpu.memory_space<vmem>>, vector<32x384xbf16>
    %c0_1 = arith.constant 0 : index
    %c0_2 = arith.constant 0 : index
    %1 = vector.load %arg2[%c0_1, %c0_2] : memref<384x128xbf16, #tpu.memory_space<vmem>>, vector<384x128xbf16>
    %cst = arith.constant dense<0.000000e+00> : vector<32x128xf32>
    %2 = tpu.matmul %0, %1, %cst {dimension_numbers = #tpu.dot_dimension_numbers<[1], [0], [0], [1], [0, 0, 1, 1], [], []>} : vector<32x384xbf16>, vector<384x128xbf16>, vector<32x128xf32> -> vector<32x128xf32>
    %c0_3 = arith.constant 0 : index
    %c0_4 = arith.constant 0 : index
    %3 = vector.load %arg3[%c0_3, %c0_4] : memref<1x128xf32, #tpu.memory_space<vmem>>, vector<1x128xf32>
    %4 = vector.broadcast %3 : vector<1x128xf32> to vector<32x128xf32>
    %5 = arith.addf %2, %4 : vector<32x128xf32>
    %6 = arith.mulf %5, %5 : vector<32x128xf32>
    %c0_5 = arith.constant 0 : index
    %c0_6 = arith.constant 0 : index
    %7 = vector.load %arg5[%c0_5, %c0_6] : memref<8x32xf32, #tpu.memory_space<vmem>>, vector<8x32xf32>
    %cst_7 = arith.constant dense<0.000000e+00> : vector<8x128xf32>
    %8 = tpu.matmul %7, %6, %cst_7 {dimension_numbers = #tpu.dot_dimension_numbers<[1], [0], [0], [1], [0, 0, 1, 1], [], []>} : vector<8x32xf32>, vector<32x128xf32>, vector<8x128xf32> -> vector<8x128xf32>
    %c0_8 = arith.constant 0 : index
    %c0_9 = arith.constant 0 : index
    %9 = vector.load %arg4[%c0_8, %c0_9] : memref<32x8xf32, #tpu.memory_space<vmem>>, vector<32x8xf32>
    %cst_10 = arith.constant dense<0.000000e+00> : vector<32x128xf32>
    %10 = tpu.matmul %9, %8, %cst_10 {dimension_numbers = #tpu.dot_dimension_numbers<[1], [0], [0], [1], [0, 0, 1, 1], [], []>} : vector<32x8xf32>, vector<8x128xf32>, vector<32x128xf32> -> vector<32x128xf32>
    %cst_11 = arith.constant 9.99999971E-10 : f32
    %11 = vector.broadcast %cst_11 : f32 to vector<32x128xf32>
    %12 = arith.addf %10, %11 : vector<32x128xf32>
    %13 = math.rsqrt %12 : vector<32x128xf32>
    %14 = arith.mulf %10, %13 : vector<32x128xf32>
    %cst_12 = arith.constant 1.000000e+00 : f32
    %15 = vector.broadcast %cst_12 : f32 to vector<32x128xf32>
    %16 = arith.addf %15, %10 : vector<32x128xf32>
    %17 = tpu.reciprocal %16 {approx = true} : vector<32x128xf32> -> vector<32x128xf32>
    %18 = arith.mulf %14, %17 : vector<32x128xf32>
    %19 = arith.mulf %5, %18 : vector<32x128xf32>
    %c0_13 = arith.constant 0 : index
    %c0_14 = arith.constant 0 : index
    %20 = vector.load %arg6[%c0_13, %c0_14] : memref<32x128xf32, #tpu.memory_space<vmem>>, vector<32x128xf32>
    tpu.vector_store %arg6[%c0_13, %c0_14], %19 {strides = array<i32>} : memref<32x128xf32, #tpu.memory_space<vmem>>, vector<32x128xf32>,
    return
  }
  func.func @transform_0(%arg0: i32) -> (i32, i32) {
    %c0_i32 = arith.constant 0 : i32
    %c0_i32_0 = arith.constant 0 : i32
    return %arg0, %c0_i32 : i32, i32
  }
  func.func @transform_1(%arg0: i32) -> (i32, i32) {
    %c0_i32 = arith.constant 0 : i32
    %c0_i32_0 = arith.constant 0 : i32
    %c0_i32_1 = arith.constant 0 : i32
    return %c0_i32, %c0_i32_0 : i32, i32
  }
  func.func @transform_2(%arg0: i32) -> (i32, i32) {
    %c0_i32 = arith.constant 0 : i32
    %c0_i32_0 = arith.constant 0 : i32
    %c0_i32_1 = arith.constant 0 : i32
    return %c0_i32, %c0_i32_0 : i32, i32
  }
  func.func @transform_3(%arg0: i32) -> (i32, i32) {
    %c0_i32 = arith.constant 0 : i32
    %c0_i32_0 = arith.constant 0 : i32
    %c0_i32_1 = arith.constant 0 : i32
    return %c0_i32, %c0_i32_0 : i32, i32
  }
  func.func @transform_4(%arg0: i32) -> (i32, i32) {
    %c0_i32 = arith.constant 0 : i32
    %c0_i32_0 = arith.constant 0 : i32
    %c0_i32_1 = arith.constant 0 : i32
    return %c0_i32, %c0_i32_0 : i32, i32
  }
  func.func @transform_5(%arg0: i32) -> (i32, i32) {
    %c0_i32 = arith.constant 0 : i32
    %c0_i32_0 = arith.constant 0 : i32
    return %arg0, %c0_i32 : i32, i32
  }
}

module attributes {stable_mosaic.version = 11 : i64} {
  func.func @_conv_squash_kernel(%arg0: i32, %arg1: memref<32x384xbf16, #tpu.memory_space<vmem>>, %arg2: memref<384x128xbf16, #tpu.memory_space<vmem>>, %arg3: memref<1x128xf32, #tpu.memory_space<vmem>>, %arg4: memref<32x8xf32, #tpu.memory_space<vmem>>, %arg5: memref<8x32xf32, #tpu.memory_space<vmem>>, %arg6: memref<32x128xf32, #tpu.memory_space<vmem>>) attributes {dimension_semantics = [#tpu.dimension_semantics<parallel>], iteration_bounds = array<i64: 1>, scalar_prefetch = 0 : i64, scratch_operands = 0 : i64, tpu.core_type = #tpu.core_type<tc>, window_params = [{transform_indices = @transform_0, window_bounds = array<i64: 32, 384>}, {pipeline_mode = #tpu.pipeline_mode<synchronous>, transform_indices = @transform_1, window_bounds = array<i64: 384, 128>}, {pipeline_mode = #tpu.pipeline_mode<synchronous>, transform_indices = @transform_2, window_bounds = array<i64: 1, 128>}, {pipeline_mode = #tpu.pipeline_mode<synchronous>, transform_indices = @transform_3, window_bounds = array<i64: 32, 8>}, {pipeline_mode = #tpu.pipeline_mode<synchronous>, transform_indices = @transform_4, window_bounds = array<i64: 8, 32>}, {transform_indices = @transform_5, window_bounds = array<i64: 32, 128>}]} {
    %c0 = arith.constant 0 : index
    %c0_0 = arith.constant 0 : index
    %0 = vector.load %arg1[%c0, %c0_0] : memref<32x384xbf16, #tpu.memory_space<vmem>>, vector<32x384xbf16>
    %c0_1 = arith.constant 0 : index
    %c0_2 = arith.constant 0 : index
    %1 = vector.load %arg2[%c0_1, %c0_2] : memref<384x128xbf16, #tpu.memory_space<vmem>>, vector<384x128xbf16>
    %cst = arith.constant dense<0.000000e+00> : vector<32x128xf32>
    %2 = tpu.matmul %0, %1, %cst {dimension_numbers = #tpu.dot_dimension_numbers<[1], [0], [0], [1], [0, 0, 1, 1], [], []>} : vector<32x384xbf16>, vector<384x128xbf16>, vector<32x128xf32> -> vector<32x128xf32>
    %c0_3 = arith.constant 0 : index
    %c0_4 = arith.constant 0 : index
    %3 = vector.load %arg3[%c0_3, %c0_4] : memref<1x128xf32, #tpu.memory_space<vmem>>, vector<1x128xf32>
    %4 = vector.broadcast %3 : vector<1x128xf32> to vector<32x128xf32>
    %5 = arith.addf %2, %4 : vector<32x128xf32>
    %6 = arith.mulf %5, %5 : vector<32x128xf32>
    %c0_5 = arith.constant 0 : index
    %c0_6 = arith.constant 0 : index
    %7 = vector.load %arg5[%c0_5, %c0_6] : memref<8x32xf32, #tpu.memory_space<vmem>>, vector<8x32xf32>
    %cst_7 = arith.constant dense<0.000000e+00> : vector<8x128xf32>
    %8 = tpu.matmul %7, %6, %cst_7 {dimension_numbers = #tpu.dot_dimension_numbers<[1], [0], [0], [1], [0, 0, 1, 1], [], []>} : vector<8x32xf32>, vector<32x128xf32>, vector<8x128xf32> -> vector<8x128xf32>
    %c0_8 = arith.constant 0 : index
    %c0_9 = arith.constant 0 : index
    %9 = vector.load %arg4[%c0_8, %c0_9] : memref<32x8xf32, #tpu.memory_space<vmem>>, vector<32x8xf32>
    %cst_10 = arith.constant dense<0.000000e+00> : vector<32x128xf32>
    %10 = tpu.matmul %9, %8, %cst_10 {dimension_numbers = #tpu.dot_dimension_numbers<[1], [0], [0], [1], [0, 0, 1, 1], [], []>} : vector<32x8xf32>, vector<8x128xf32>, vector<32x128xf32> -> vector<32x128xf32>
    %cst_11 = arith.constant 9.99999971E-10 : f32
    %11 = vector.broadcast %cst_11 : f32 to vector<32x128xf32>
    %12 = arith.addf %10, %11 : vector<32x128xf32>
    %13 = math.rsqrt %12 : vector<32x128xf32>
    %14 = arith.mulf %10, %13 : vector<32x128xf32>
    %cst_12 = arith.constant 1.000000e+00 : f32
    %15 = vector.broadcast %cst_12 : f32 to vector<32x128xf32>
    %16 = arith.addf %15, %10 : vector<32x128xf32>
    %17 = tpu.reciprocal %16 {approx = true} : vector<32x128xf32> -> vector<32x128xf32>
    %18 = arith.mulf %14, %17 : vector<32x128xf32>
    %19 = arith.mulf %5, %18 : vector<32x128xf32>
    %c0_13 = arith.constant 0 : index
    %c0_14 = arith.constant 0 : index
    %20 = vector.load %arg6[%c0_13, %c0_14] : memref<32x128xf32, #tpu.memory_space<vmem>>, vector<32x128xf32>
    tpu.vector_store %arg6[%c0_13, %c0_14], %19 {strides = array<i32>} : memref<32x128xf32, #tpu.memory_space<vmem>>, vector<32x128xf32>,
    return
  }
  func.func @transform_0(%arg0: i32) -> (i32, i32) {
    %c0_i32 = arith.constant 0 : i32
    %c0_i32_0 = arith.constant 0 : i32
    return %arg0, %c0_i32 : i32, i32
  }
  func.func @transform_1(%arg0: i32) -> (i32, i32) {
    %c0_i32 = arith.constant 0 : i32
    %c0_i32_0 = arith.constant 0 : i32
    %c0_i32_1 = arith.constant 0 : i32
    return %c0_i32, %c0_i32_0 : i32, i32
  }
  func.func @transform_2(%arg0: i32) -> (i32, i32) {
    %c0_i32 = arith.constant 0 : i32
    %c0_i32_0 = arith.constant 0 : i32
    %c0_i32_1 = arith.constant 0 : i32
    return %c0_i32, %c0_i32_0 : i32, i32
  }
  func.func @transform_3(%arg0: i32) -> (i32, i32) {
    %c0_i32 = arith.constant 0 : i32
    %c0_i32_0 = arith.constant 0 : i32
    %c0_i32_1 = arith.constant 0 : i32
    return %c0_i32, %c0_i32_0 : i32, i32
  }
  func.func @transform_4(%arg0: i32) -> (i32, i32) {
    %c0_i32 = arith.constant 0 : i32
    %c0_i32_0 = arith.constant 0 : i32
    %c0_i32_1 = arith.constant 0 : i32
    return %c0_i32, %c0_i32_0 : i32, i32
  }
  func.func @transform_5(%arg0: i32) -> (i32, i32) {
    %c0_i32 = arith.constant 0 : i32
    %c0_i32_0 = arith.constant 0 : i32
    return %arg0, %c0_i32 : i32, i32
  }
}

</mosaic_0001>

<bundles_post_ra>
// kernel: tpu_custom_call.1
= control target key start
LH: loop header
LB: loop body
LE: loop exit
PB: predicated region body
PF: predicated region fallthrough
CT: control target
= control target key end

     0   :  { %10 = vsyncpa [#allocation3], 0  ;;  %s990_s0 = inlined_call_operand.hbm [shape: bf16[32,384], index: 0, kind: input, shape index: {}]   ;;  %s991_s1 = inlined_call_operand.hbm [shape: bf16[384,128], index: 1, kind: input, shape index: {}]   ;;  %s992_s2 = inlined_call_operand.vmem [shape: f32[1,128], index: 2, kind: input, shape index: {}]   ;;  %s993_s3 = inlined_call_operand.vmem [shape: f32[32,8], index: 3, kind: input, shape index: {}]   ;;  %s994_s4 = inlined_call_operand.vmem [shape: f32[8,32], index: 4, kind: input, shape index: {}]   ;;  %s995_s5 = inlined_call_operand.hbm [shape: f32[32,128], index: 5, kind: output, shape index: {}]  }
   0x1   :  { %11 = vsyncpa [#allocation6], 0 }
   0x2   :  { %12 = vsyncpa [#allocation4], 0  ;;  %s879_s18 = smov [#allocation2]   ;;  %s807_s22 = scalar_lea.hbm %s990_s0, 768 }
   0x3   :  { %s18_s19 = sshll.u32 %s879_s18, 4  ;;  %p808_p0 = scmp.ne.s32.totalorder %s990_s0, %s807_s22  ;;  %s19_s19 = int_to_ptr.vmem [resolvable:$true] %s18_s19 }
   0x4   :  { %p811_p1 = scmp.lt.u32.totalorder %s807_s22, %s990_s0 }
   0x6   :  { %p813_p2 = pnand %p811_p1, %p808_p0 }
   0x8   :  { %816 = shalt.err (!%p813_p2)
}
   0x9   :  { %s817_s27 = scalar_lea.vmem %s19_s19, 768  ;;  %p822_p4 = scmp.lt.s32.totalorder %s19_s19, %s19_s19 }
   0xa   :  { %p818_p3 = scmp.ne.s32.totalorder %s19_s19, %s817_s27  ;;  %p823_p5 = scmp.lt.s32.totalorder %s817_s27, %s817_s27 }
   0xc   :  { %p824_p6 = por %p823_p5, %p822_p4 }
   0xe   :  { %p825_p7 = pnand %p824_p6, %p818_p3 }
  0x10   :  { %828 = shalt.err (!%p825_p7)
}
  0x11   :  { %s880_s28 = smov 192   ;;  %s881_s29 = smov 12  }
  0x12   :  { %24 = dma.hbm_to_vmem [thread:$0]  %s990_s0, 768, %s19_s19, [#allocation3], %s880_s28, %s880_s28, %s881_s29  }
  0x13   :  { %s882_s7 = smov [#allocation5]   ;;  %s829_s11 = scalar_lea.hbm %s991_s1, 3072 }
  0x14   :  { %s30_s8 = sshll.u32 %s882_s7, 4  ;;  %p830_p8 = scmp.ne.s32.totalorder %s991_s1, %s829_s11  ;;  %s31_s8 = int_to_ptr.vmem [resolvable:$true] %s30_s8 }
  0x15   :  { %p833_p9 = scmp.lt.u32.totalorder %s829_s11, %s991_s1 }
  0x17   :  { %p835_p10 = pnand %p833_p9, %p830_p8 }
  0x19   :  { %838 = shalt.err (!%p835_p10)
}
  0x1a   :  { %s839_s16 = scalar_lea.vmem %s31_s8, 3072  ;;  %p844_p12 = scmp.lt.s32.totalorder %s31_s8, %s31_s8 }
  0x1b   :  { %p840_p11 = scmp.ne.s32.totalorder %s31_s8, %s839_s16  ;;  %p845_p13 = scmp.lt.s32.totalorder %s839_s16, %s839_s16 }
  0x1d   :  { %p846_p0 = por %p845_p13, %p844_p12 }
  0x1f   :  { %p847_p1 = pnand %p846_p0, %p840_p11 }
  0x21   :  { %850 = shalt.err (!%p847_p1)
}
  0x22   :  { %s883_s0 = smov 64   ;;  %s884_s17 = smov 4  }
  0x23   :  { %36 = dma.hbm_to_vmem [thread:$0]  %s991_s1, 3072, %s31_s8, [#allocation6], %s883_s0, %s883_s0, %s884_s17  }
  0x24   :  { %873 = dma.done.wait [#allocation3], 768  }
  0x25   :  { %874 = vsyncadd [#allocation3], 4294966528 }
  0x26   :  { %875 = dma.done.wait [#allocation6], 3072  }
  0x27   :  { %876 = vsyncadd [#allocation6], 4294964224  ;;  %v759_v0 = vld [vmem:[#allocation5 + $0x40] sm:$0xff]   ;;  %v761_v2 = vld [vmem:[#allocation5 + $0x48] sm:$0xff]   ;;  %v885_v30 = vmov 0.0|0.0   ;;  %vm886_vm0 = vmmov 0  }
  0x28   :  { %v760_v1 = vld [vmem:[#allocation5] sm:$0xff]   ;;  %654 = vmatprep.subr.bf16.mxu0 %v759_v0  ;;  %v763_v4 = vld [vmem:[#allocation5 + $0x8] sm:$0xff]   ;;  %v764_v5 = vld [vmem:[#allocation5 + $0x50] sm:$0xff]   ;;  %v887_v31 = vmov 0.0   ;;  %vm392_vm1 = vcmask 261120   ;;  %vm470_vm2 = vcmask 64512  }
  0x29   :  { %655 = vmatpush3.bf16.msra.mxu0 %v760_v1  ;;  %v762_v3 = vld [vmem:[#allocation5 + $0x80] sm:$0xff]   ;;  %v765_v6 = vld [vmem:[#allocation5 + $0x88] sm:$0xff]   ;;  %v766_v7 = vld [vmem:[#allocation5 + $0x10] sm:$0xff]  }
  0x2a   :  { %656 = vmatprep.subr.bf16.mxu0 %v761_v2  ;;  %702 = vmatprep.subr.bf16.mxu1 %v762_v3  ;;  %v767_v8 = vld [vmem:[#allocation5 + $0x58] sm:$0xff]   ;;  %v768_v9 = vld [vmem:[#allocation5 + $0x90] sm:$0xff]   ;;  %v770_v11 = vld [vmem:[#allocation5 + $0x60] sm:$0xff]  }
  0x2b   :  { %703 = vmatpush3.bf16.msra.mxu1 %v762_v3  ;;  %v769_v10 = vld [vmem:[#allocation5 + $0x18] sm:$0xff]   ;;  %v772_v13 = vld [vmem:[#allocation5 + $0x20] sm:$0xff]   ;;  %v773_v15 = vld [vmem:[#allocation5 + $0x68] sm:$0xff]  }
  0x2c   :  { %704 = vmatprep.subr.bf16.mxu1 %v765_v6  ;;  %v771_v12 = vld [vmem:[#allocation5 + $0x98] sm:$0xff]   ;;  %v774_v14 = vld [vmem:[#allocation5 + $0xa0] sm:$0xff]   ;;  %v775_v16 = vld [vmem:[#allocation5 + $0x28] sm:$0xff]  }
  0x2d   :  { %657 = vmatpush3.bf16.msra.mxu0 %v763_v4  ;;  %v777_v17 = vld [vmem:[#allocation5 + $0xa8] sm:$0xff]   ;;  %v776_v18 = vld [vmem:[#allocation5 + $0x70] sm:$0xff]   ;;  %v779_v20 = vld [vmem:[#allocation5 + $0x78] sm:$0xff]  }
  0x2e   :  { %658 = vmatprep.subr.bf16.mxu0 %v764_v5  ;;  %v778_v19 = vld [vmem:[#allocation5 + $0x30] sm:$0xff]   ;;  %v781_v23 = vld [vmem:[#allocation5 + $0x38] sm:$0xff]   ;;  %v468_v4 = vld [vmem:[%s993_s3 + $0x10] sm:$0xff] }
  0x2f   :  { %705 = vmatpush3.bf16.msra.mxu1 %v765_v6  ;;  %v780_v21 = vld [vmem:[#allocation5 + $0xb0] sm:$0xff]   ;;  %v786_v24 = vld [vmem:[#allocation2 + $0x8] ss:$12 sps:$4 sm:$0xff]   ;;  %v469_v5 = vld [vmem:[%s993_s3 + $0x18] sm:$0xff] }
  0x30   :  { %706 = vmatprep.subr.bf16.mxu1 %v768_v9  ;;  %v784_v22 = vld [vmem:[#allocation2 + $0x4] ss:$12 sps:$4 sm:$0xff]   ;;  %v785_v25 = vld [vmem:[#allocation5 + $0xb8] sm:$0xff]   ;;  %718 = vmatprep.mubr.bf16.mxu1 %v786_v24  ;;  %v618_v34 = vld [vmem:[%s992_s2] ss:$0 sm:$0xff] }
  0x31   :  { %659 = vmatpush3.bf16.msra.mxu0 %v766_v7  ;;  %321 = vmatprep.mubr.bf16.mxu0 %v784_v22  ;;  %v782_v26 = vld [vmem:[#allocation2] ss:$12 sps:$4 sm:$0xff]   ;;  %v788_v27 = vld [vmem:[#allocation2 + $0x1c] ss:$12 sps:$4 sm:$0xff]   ;;  %v790_v29 = vld [vmem:[#allocation2 + $0x18] ss:$12 sps:$4 sm:$0xff]  }
  0x32   :  { %660 = vmatprep.subr.bf16.mxu0 %v767_v8  ;;  %v787_v28 = vld [vmem:[#allocation2 + $0x20] ss:$12 sps:$4 sm:$0xff]  }
  0x33   :  { %707 = vmatpush3.bf16.msra.mxu1 %v768_v9  ;;  %v391_v63 = vld [vmem:[%s994_s4] sm:$0xff]  ;;  %v467_v2 = vld [vmem:[%s993_s3 + $0x8] sm:$0xff] }
  0x34   :  { %708 = vmatprep.subr.bf16.mxu1 %v771_v12  ;;  %v466_v0 = vld [vmem:[%s993_s3] sm:$0xff]  ;;  %s888_s3 = smov [#allocation7]  }
  0x35   :  { %661 = vmatpush3.bf16.msra.mxu0 %v769_v10  ;;  %s605_s29 = sshll.u32 %s888_s3, 4  ;;  %s606_s29 = int_to_ptr.vmem [resolvable:$true] %s605_s29 }
  0x36   :  { %662 = vmatprep.subr.bf16.mxu0 %v770_v11  ;;  %s851_s30 = scalar_lea.vmem %s606_s29, 512  ;;  %p856_p3 = scmp.lt.s32.totalorder %s606_s29, %s606_s29 }
  0x37   :  { %709 = vmatpush3.bf16.msra.mxu1 %v771_v12  ;;  %p852_p2 = scmp.ne.s32.totalorder %s606_s29, %s851_s30  ;;  %p857_p4 = scmp.lt.s32.totalorder %s851_s30, %s851_s30 }
  0x38   :  { %710 = vmatprep.subr.bf16.mxu1 %v774_v14 }
  0x39   :  { %663 = vmatpush3.bf16.msra.mxu0 %v772_v13  ;;  %p858_p5 = por %p857_p4, %p856_p3 }
  0x3a   :  { %664 = vmatprep.subr.bf16.mxu0 %v773_v15 }
  0x3b   :  { %711 = vmatpush3.bf16.msra.mxu1 %v774_v14  ;;  %p859_p6 = pnand %p858_p5, %p852_p2 }
  0x3c   :  { %712 = vmatprep.subr.bf16.mxu1 %v777_v17 }
  0x3d   :  { %665 = vmatpush3.bf16.msra.mxu0 %v775_v16 }
  0x3e   :  { %666 = vmatprep.subr.bf16.mxu0 %v776_v18 }
  0x3f   :  { %713 = vmatpush3.bf16.msra.mxu1 %v777_v17 }
  0x40   :  { %714 = vmatprep.subr.bf16.mxu1 %v780_v21 }
  0x41   :  { %667 = vmatpush3.bf16.msra.mxu0 %v778_v19 }
  0x42   :  { %668 = vmatprep.subr.bf16.mxu0 %v779_v20 }
  0x43   :  { %715 = vmatpush3.bf16.msra.mxu1 %v780_v21 }
  0x44   :  { %716 = vmatprep.subr.bf16.mxu1 %v785_v25 }
  0x45   :  { %669 = vmatpush3.bf16.msra.mxu0 %v781_v23 }
  0x47   :  { %717 = vmatpush3.bf16.msra.mxu1 %v785_v25 }
  0x48   :  { %322 = vmatmul.mubr.bf16.vlgmr.msra.gmra.mrb[0].mxu0 %v782_v26  ;;  %741 = vmatprep.subr.bf16.mxu1 %v885_v30 }
  0x49   :  { %329 = vmatprep.mubr.bf16.mxu0 %v788_v27 }
  0x4a   :  { %719 = vmatmul.mubr.bf16.vlgmr.msra.gmra.mrb[0].mxu1 %v787_v28 }
  0x4b   :  { %730 = vmatprep.mubr.msk.f32.mxu1 %vm886_vm0, %v887_v31 }
  0x50   :  { %330 = vmatmul.mubr.bf16.gmra.mrb[4].mxu0 %v790_v29 }
 0x11b   :  { %v670_v32 = vpop.f32.mrb[0].mxu0 }
 0x11c   :  { %v671_v33 = vpop.f32.mrb[1].mxu0 }
 0x11d   :  { %v672_v35 = vadd.f32 %v671_v33, %v670_v32  ;;  %v673_v36 = vpop.f32.mrb[2].mxu0  ;;  %v720_v38 = vpop.f32.mrb[0].mxu1 }
 0x11e   :  { %v674_v37 = vpop.f32.mrb[3].mxu0  ;;  %v372_v41 = vpop.f32.mrb[1].mxu1 }
 0x11f   :  { %v675_v39 = vadd.f32 %v674_v37, %v673_v36  ;;  %v324_v40 = vadd.f32 %v672_v35, %v618_v34  ;;  %v721_v42 = vpop.f32.mrb[2].mxu1 }
 0x120   :  { %v375_v45 = vpop.f32.mrb[3].mxu1 }
 0x121   :  { %v948_v43 = vadd.f32 %v372_v41, %v324_v40  ;;  %v327_v44 = vadd.f32 %v675_v39, %v618_v34 }
 0x123   :  { %v950_v46 = vadd.f32 %v375_v45, %v327_v44  ;;  %v676_v47 = vpop.f32.mrb[4].mxu0  ;;  %v387_v49 = vmul.f32 %v948_v43, %v948_v43 }
 0x124   :  { %v677_v48 = vpop.f32.mrb[5].mxu0 }
 0x125   :  { %v388_v50 = vmul.f32 %v950_v46, %v950_v46  ;;  %v678_v51 = vadd.f32 %v677_v48, %v676_v47  ;;  %v679_v52 = vpop.f32.mrb[6].mxu0 }
 0x126   :  { %v680_v53 = vpop.f32.mrb[7].mxu0 }
 0x127   :  { %v742_v54 = vpack.c.bf16 %v388_v50, %v387_v49  ;;  %v332_v55 = vadd.f32 %v678_v51, %v618_v34  ;;  %v681_v56 = vadd.f32 %v680_v53, %v679_v52 }
 0x129   :  { %v956_v57 = vadd.f32 %v720_v38, %v332_v55  ;;  %v335_v58 = vadd.f32 %v681_v56, %v618_v34  ;;  %743 = vmatpush3.bf16.msra.mxu1 %v742_v54 }
 0x12a   :  { %744 = vmatprep.subr.bf16.mxu1 %v885_v30 }
 0x12b   :  { %v384_v59 = vadd.f32 %v721_v42, %v335_v58  ;;  %v389_v60 = vmul.f32 %v956_v57, %v956_v57 }
 0x12d   :  { %v390_v61 = vmul.f32 %v384_v59, %v384_v59 }
 0x12f   :  { %v745_v62 = vpack.c.bf16 %v390_v61, %v389_v60 }
 0x131   :  { %746 = vmatpush3.bf16.msra.mxu1 %v745_v62 }
 0x134   :  { %731 = vmatmul.mubr.msk.f32.vlgmr.msra.gmra.mrb[4].mxu1 %vm392_vm1, %v391_v63 }
 0x135   :  { %735 = vmatprep.mubr.msk.f32.mxu1 %vm470_vm2, %v466_v0 }
 0x207   :  { %v462_v1 = vpop.f32.mrb[4].mxu1 }
 0x208   :  { %v732_v3 = vpop.f32.mrb[5].mxu1  ;;  %733 = vmatprep.subr.mxu1 %v462_v1 }
 0x209   :  { %734 = vmatpush3.msra.mxu1 %v462_v1 }
 0x20a   :  { %736 = vmatmul.mubr.msk.f32.vlgmr.msra.gmra.mrb[6].mxu1 %vm470_vm2, %v467_v2 }
 0x20b   :  { %738 = vmatprep.mubr.msk.f32.mxu1 %vm470_vm2, %v468_v4 }
 0x20e   :  { %739 = vmatmul.mubr.msk.f32.gmra.mrb[8].mxu1 %vm470_vm2, %v469_v5 }
 0x2dd   :  { %v737_v6 = vpop.f32.mrb[6].mxu1 }
 0x2de   :  { %v569_v7 = vadd.f32 1e-09, %v737_v6  ;;  %v581_v8 = vadd.f32 1.0, %v737_v6  ;;  %v549_v9 = vpop.f32.mrb[7].mxu1 }
 0x2df   :  { %v568_v10 = vadd.f32 1e-09, %v549_v9  ;;  %v580_v11 = vadd.f32 1.0, %v549_v9 }
 0x2e0   :  { %791 = vrsqrt.f32 %v569_v7 }
 0x2e1   :  { %793 = vrcp.f32 %v581_v8  ;;  %v740_v12 = vpop.f32.mrb[8].mxu1 }
 0x2e2   :  { %795 = vrsqrt.f32 %v568_v10  ;;  %v571_v13 = vadd.f32 1e-09, %v740_v12  ;;  %v583_v14 = vadd.f32 1.0, %v740_v12  ;;  %v559_v15 = vpop.f32.mrb[9].mxu1 }
 0x2e3   :  { %797 = vrcp.f32 %v580_v11  ;;  %v570_v16 = vadd.f32 1e-09, %v559_v15  ;;  %v582_v17 = vadd.f32 1.0, %v559_v15 }
 0x2e4   :  { %799 = vrsqrt.f32 %v571_v13 }
 0x2e5   :  { %801 = vrcp.f32 %v583_v14 }
 0x2e6   :  { %803 = vrsqrt.f32 %v570_v16 }
 0x2e7   :  { %805 = vrcp.f32 %v582_v17 }
 0x2ea   :  { %v792_v18 = vpop.eup %791 }
 0x2eb   :  { %v794_v19 = vpop.eup %793  ;;  %v577_v20 = vmul.f32 %v792_v18, %v737_v6 }
 0x2ec   :  { %v796_v21 = vpop.eup %795 }
 0x2ed   :  { %v798_v22 = vpop.eup %797  ;;  %v589_v23 = vmul.f32 %v794_v19, %v577_v20  ;;  %v576_v24 = vmul.f32 %v796_v21, %v549_v9 }
 0x2ee   :  { %v800_v25 = vpop.eup %799 }
 0x2ef   :  { %v802_v26 = vpop.eup %801  ;;  %v593_v27 = vmul.f32 %v589_v23, %v950_v46  ;;  %v588_v28 = vmul.f32 %v798_v22, %v576_v24  ;;  %v579_v29 = vmul.f32 %v800_v25, %v740_v12 }
 0x2f0   :  { %v804_v30 = vpop.eup %803 }
 0x2f1   :  { %597 = vst [vmem:[#allocation7 + $0x8] sm:$0xff] %v593_v27  ;;  %v592_v31 = vmul.f32 %v588_v28, %v948_v43  ;;  %v591_v32 = vmul.f32 %v802_v26, %v579_v29  ;;  %v578_v33 = vmul.f32 %v804_v30, %v559_v15  ;;  %v806_v34 = vpop.eup %805 }
 0x2f3   :  { %596 = vst [vmem:[#allocation7] sm:$0xff] %v592_v31  ;;  %v595_v35 = vmul.f32 %v591_v32, %v384_v59  ;;  %v590_v36 = vmul.f32 %v806_v34, %v578_v33 }
 0x2f5   :  { %599 = vst [vmem:[#allocation7 + $0x18] sm:$0xff] %v595_v35  ;;  %v594_v37 = vmul.f32 %v590_v36, %v956_v57 }
 0x2f7   :  { %598 = vst [vmem:[#allocation7 + $0x10] sm:$0xff] %v594_v37 }
 0x2f8   :  { %862 = shalt.err (!%p859_p6)
}
 0x2f9   :  { %s863_s8 = scalar_lea.hbm %s995_s5, 512 }
 0x2fa   :  { %p864_p7 = scmp.ne.s32.totalorder %s995_s5, %s863_s8  ;;  %p867_p8 = scmp.lt.u32.totalorder %s863_s8, %s995_s5 }
 0x2fc   :  { %p869_p9 = pnand %p867_p8, %p864_p7 }
 0x2fe   :  { %872 = shalt.err (!%p869_p9)
}
 0x2ff   :  { %s889_s13 = smov 128   ;;  %s890_s14 = smov 8  }
 0x300   :  { %611 = dma.vmem_to_hbm [thread:$0]  %s606_s29, 512, %s995_s5, [#allocation4], %s889_s13, %s889_s13, %s890_s14  }
 0x301   :  { %877 = dma.done.wait [#allocation4], 512  }
 0x302   :  { %878 = vsyncadd [#allocation4], 4294966784 }
 0x303   :  { %615 = vsyncpa [#allocation3], 1 }
 0x304   :  { %616 = vsyncpa [#allocation6], 1 }
 0x305   :  { %617 = vsyncpa [#allocation4], 1 }

// kernel: tpu_custom_call.1
= control target key start
LH: loop header
LB: loop body
LE: loop exit
PB: predicated region body
PF: predicated region fallthrough
CT: control target
= control target key end

     0   :  { %10 = vsyncpa [#allocation3], 0  ;;  %s990_s0 = inlined_call_operand.hbm [shape: bf16[32,384], index: 0, kind: input, shape index: {}]   ;;  %s991_s1 = inlined_call_operand.hbm [shape: bf16[384,128], index: 1, kind: input, shape index: {}]   ;;  %s992_s2 = inlined_call_operand.vmem [shape: f32[1,128], index: 2, kind: input, shape index: {}]   ;;  %s993_s3 = inlined_call_operand.vmem [shape: f32[32,8], index: 3, kind: input, shape index: {}]   ;;  %s994_s4 = inlined_call_operand.vmem [shape: f32[8,32], index: 4, kind: input, shape index: {}]   ;;  %s995_s5 = inlined_call_operand.hbm [shape: f32[32,128], index: 5, kind: output, shape index: {}]  }
   0x1   :  { %11 = vsyncpa [#allocation6], 0 }
   0x2   :  { %12 = vsyncpa [#allocation4], 0  ;;  %s879_s18 = smov [#allocation2]   ;;  %s807_s22 = scalar_lea.hbm %s990_s0, 768 }
   0x3   :  { %s18_s19 = sshll.u32 %s879_s18, 4  ;;  %p808_p0 = scmp.ne.s32.totalorder %s990_s0, %s807_s22  ;;  %s19_s19 = int_to_ptr.vmem [resolvable:$true] %s18_s19 }
   0x4   :  { %p811_p1 = scmp.lt.u32.totalorder %s807_s22, %s990_s0 }
   0x6   :  { %p813_p2 = pnand %p811_p1, %p808_p0 }
   0x8   :  { %816 = shalt.err (!%p813_p2)
}
   0x9   :  { %s817_s27 = scalar_lea.vmem %s19_s19, 768  ;;  %p822_p4 = scmp.lt.s32.totalorder %s19_s19, %s19_s19 }
   0xa   :  { %p818_p3 = scmp.ne.s32.totalorder %s19_s19, %s817_s27  ;;  %p823_p5 = scmp.lt.s32.totalorder %s817_s27, %s817_s27 }
   0xc   :  { %p824_p6 = por %p823_p5, %p822_p4 }
   0xe   :  { %p825_p7 = pnand %p824_p6, %p818_p3 }
  0x10   :  { %828 = shalt.err (!%p825_p7)
}
  0x11   :  { %s880_s28 = smov 192   ;;  %s881_s29 = smov 12  }
  0x12   :  { %24 = dma.hbm_to_vmem [thread:$0]  %s990_s0, 768, %s19_s19, [#allocation3], %s880_s28, %s880_s28, %s881_s29  }
  0x13   :  { %s882_s7 = smov [#allocation5]   ;;  %s829_s11 = scalar_lea.hbm %s991_s1, 3072 }
  0x14   :  { %s30_s8 = sshll.u32 %s882_s7, 4  ;;  %p830_p8 = scmp.ne.s32.totalorder %s991_s1, %s829_s11  ;;  %s31_s8 = int_to_ptr.vmem [resolvable:$true] %s30_s8 }
  0x15   :  { %p833_p9 = scmp.lt.u32.totalorder %s829_s11, %s991_s1 }
  0x17   :  { %p835_p10 = pnand %p833_p9, %p830_p8 }
  0x19   :  { %838 = shalt.err (!%p835_p10)
}
  0x1a   :  { %s839_s16 = scalar_lea.vmem %s31_s8, 3072  ;;  %p844_p12 = scmp.lt.s32.totalorder %s31_s8, %s31_s8 }
  0x1b   :  { %p840_p11 = scmp.ne.s32.totalorder %s31_s8, %s839_s16  ;;  %p845_p13 = scmp.lt.s32.totalorder %s839_s16, %s839_s16 }
  0x1d   :  { %p846_p0 = por %p845_p13, %p844_p12 }
  0x1f   :  { %p847_p1 = pnand %p846_p0, %p840_p11 }
  0x21   :  { %850 = shalt.err (!%p847_p1)
}
  0x22   :  { %s883_s0 = smov 64   ;;  %s884_s17 = smov 4  }
  0x23   :  { %36 = dma.hbm_to_vmem [thread:$0]  %s991_s1, 3072, %s31_s8, [#allocation6], %s883_s0, %s883_s0, %s884_s17  }
  0x24   :  { %873 = dma.done.wait [#allocation3], 768  }
  0x25   :  { %874 = vsyncadd [#allocation3], 4294966528 }
  0x26   :  { %875 = dma.done.wait [#allocation6], 3072  }
  0x27   :  { %876 = vsyncadd [#allocation6], 4294964224  ;;  %v759_v0 = vld [vmem:[#allocation5 + $0x40] sm:$0xff]   ;;  %v761_v2 = vld [vmem:[#allocation5 + $0x48] sm:$0xff]   ;;  %v885_v30 = vmov 0.0|0.0   ;;  %vm886_vm0 = vmmov 0  }
  0x28   :  { %v760_v1 = vld [vmem:[#allocation5] sm:$0xff]   ;;  %654 = vmatprep.subr.bf16.mxu0 %v759_v0  ;;  %v763_v4 = vld [vmem:[#allocation5 + $0x8] sm:$0xff]   ;;  %v764_v5 = vld [vmem:[#allocation5 + $0x50] sm:$0xff]   ;;  %v887_v31 = vmov 0.0   ;;  %vm392_vm1 = vcmask 261120   ;;  %vm470_vm2 = vcmask 64512  }
  0x29   :  { %655 = vmatpush3.bf16.msra.mxu0 %v760_v1  ;;  %v762_v3 = vld [vmem:[#allocation5 + $0x80] sm:$0xff]   ;;  %v765_v6 = vld [vmem:[#allocation5 + $0x88] sm:$0xff]   ;;  %v766_v7 = vld [vmem:[#allocation5 + $0x10] sm:$0xff]  }
  0x2a   :  { %656 = vmatprep.subr.bf16.mxu0 %v761_v2  ;;  %702 = vmatprep.subr.bf16.mxu1 %v762_v3  ;;  %v767_v8 = vld [vmem:[#allocation5 + $0x58] sm:$0xff]   ;;  %v768_v9 = vld [vmem:[#allocation5 + $0x90] sm:$0xff]   ;;  %v770_v11 = vld [vmem:[#allocation5 + $0x60] sm:$0xff]  }
  0x2b   :  { %703 = vmatpush3.bf16.msra.mxu1 %v762_v3  ;;  %v769_v10 = vld [vmem:[#allocation5 + $0x18] sm:$0xff]   ;;  %v772_v13 = vld [vmem:[#allocation5 + $0x20] sm:$0xff]   ;;  %v773_v15 = vld [vmem:[#allocation5 + $0x68] sm:$0xff]  }
  0x2c   :  { %704 = vmatprep.subr.bf16.mxu1 %v765_v6  ;;  %v771_v12 = vld [vmem:[#allocation5 + $0x98] sm:$0xff]   ;;  %v774_v14 = vld [vmem:[#allocation5 + $0xa0] sm:$0xff]   ;;  %v775_v16 = vld [vmem:[#allocation5 + $0x28] sm:$0xff]  }
  0x2d   :  { %657 = vmatpush3.bf16.msra.mxu0 %v763_v4  ;;  %v777_v17 = vld [vmem:[#allocation5 + $0xa8] sm:$0xff]   ;;  %v776_v18 = vld [vmem:[#allocation5 + $0x70] sm:$0xff]   ;;  %v779_v20 = vld [vmem:[#allocation5 + $0x78] sm:$0xff]  }
  0x2e   :  { %658 = vmatprep.subr.bf16.mxu0 %v764_v5  ;;  %v778_v19 = vld [vmem:[#allocation5 + $0x30] sm:$0xff]   ;;  %v781_v23 = vld [vmem:[#allocation5 + $0x38] sm:$0xff]   ;;  %v468_v4 = vld [vmem:[%s993_s3 + $0x10] sm:$0xff] }
  0x2f   :  { %705 = vmatpush3.bf16.msra.mxu1 %v765_v6  ;;  %v780_v21 = vld [vmem:[#allocation5 + $0xb0] sm:$0xff]   ;;  %v786_v24 = vld [vmem:[#allocation2 + $0x8] ss:$12 sps:$4 sm:$0xff]   ;;  %v469_v5 = vld [vmem:[%s993_s3 + $0x18] sm:$0xff] }
  0x30   :  { %706 = vmatprep.subr.bf16.mxu1 %v768_v9  ;;  %v784_v22 = vld [vmem:[#allocation2 + $0x4] ss:$12 sps:$4 sm:$0xff]   ;;  %v785_v25 = vld [vmem:[#allocation5 + $0xb8] sm:$0xff]   ;;  %718 = vmatprep.mubr.bf16.mxu1 %v786_v24  ;;  %v618_v34 = vld [vmem:[%s992_s2] ss:$0 sm:$0xff] }
  0x31   :  { %659 = vmatpush3.bf16.msra.mxu0 %v766_v7  ;;  %321 = vmatprep.mubr.bf16.mxu0 %v784_v22  ;;  %v782_v26 = vld [vmem:[#allocation2] ss:$12 sps:$4 sm:$0xff]   ;;  %v788_v27 = vld [vmem:[#allocation2 + $0x1c] ss:$12 sps:$4 sm:$0xff]   ;;  %v790_v29 = vld [vmem:[#allocation2 + $0x18] ss:$12 sps:$4 sm:$0xff]  }
  0x32   :  { %660 = vmatprep.subr.bf16.mxu0 %v767_v8  ;;  %v787_v28 = vld [vmem:[#allocation2 + $0x20] ss:$12 sps:$4 sm:$0xff]  }
  0x33   :  { %707 = vmatpush3.bf16.msra.mxu1 %v768_v9  ;;  %v391_v63 = vld [vmem:[%s994_s4] sm:$0xff]  ;;  %v467_v2 = vld [vmem:[%s993_s3 + $0x8] sm:$0xff] }
  0x34   :  { %708 = vmatprep.subr.bf16.mxu1 %v771_v12  ;;  %v466_v0 = vld [vmem:[%s993_s3] sm:$0xff]  ;;  %s888_s3 = smov [#allocation7]  }
  0x35   :  { %661 = vmatpush3.bf16.msra.mxu0 %v769_v10  ;;  %s605_s29 = sshll.u32 %s888_s3, 4  ;;  %s606_s29 = int_to_ptr.vmem [resolvable:$true] %s605_s29 }
  0x36   :  { %662 = vmatprep.subr.bf16.mxu0 %v770_v11  ;;  %s851_s30 = scalar_lea.vmem %s606_s29, 512  ;;  %p856_p3 = scmp.lt.s32.totalorder %s606_s29, %s606_s29 }
  0x37   :  { %709 = vmatpush3.bf16.msra.mxu1 %v771_v12  ;;  %p852_p2 = scmp.ne.s32.totalorder %s606_s29, %s851_s30  ;;  %p857_p4 = scmp.lt.s32.totalorder %s851_s30, %s851_s30 }
  0x38   :  { %710 = vmatprep.subr.bf16.mxu1 %v774_v14 }
  0x39   :  { %663 = vmatpush3.bf16.msra.mxu0 %v772_v13  ;;  %p858_p5 = por %p857_p4, %p856_p3 }
  0x3a   :  { %664 = vmatprep.subr.bf16.mxu0 %v773_v15 }
  0x3b   :  { %711 = vmatpush3.bf16.msra.mxu1 %v774_v14  ;;  %p859_p6 = pnand %p858_p5, %p852_p2 }
  0x3c   :  { %712 = vmatprep.subr.bf16.mxu1 %v777_v17 }
  0x3d   :  { %665 = vmatpush3.bf16.msra.mxu0 %v775_v16 }
  0x3e   :  { %666 = vmatprep.subr.bf16.mxu0 %v776_v18 }
  0x3f   :  { %713 = vmatpush3.bf16.msra.mxu1 %v777_v17 }
  0x40   :  { %714 = vmatprep.subr.bf16.mxu1 %v780_v21 }
  0x41   :  { %667 = vmatpush3.bf16.msra.mxu0 %v778_v19 }
  0x42   :  { %668 = vmatprep.subr.bf16.mxu0 %v779_v20 }
  0x43   :  { %715 = vmatpush3.bf16.msra.mxu1 %v780_v21 }
  0x44   :  { %716 = vmatprep.subr.bf16.mxu1 %v785_v25 }
  0x45   :  { %669 = vmatpush3.bf16.msra.mxu0 %v781_v23 }
  0x47   :  { %717 = vmatpush3.bf16.msra.mxu1 %v785_v25 }
  0x48   :  { %322 = vmatmul.mubr.bf16.vlgmr.msra.gmra.mrb[0].mxu0 %v782_v26  ;;  %741 = vmatprep.subr.bf16.mxu1 %v885_v30 }
  0x49   :  { %329 = vmatprep.mubr.bf16.mxu0 %v788_v27 }
  0x4a   :  { %719 = vmatmul.mubr.bf16.vlgmr.msra.gmra.mrb[0].mxu1 %v787_v28 }
  0x4b   :  { %730 = vmatprep.mubr.msk.f32.mxu1 %vm886_vm0, %v887_v31 }
  0x50   :  { %330 = vmatmul.mubr.bf16.gmra.mrb[4].mxu0 %v790_v29 }
 0x11b   :  { %v670_v32 = vpop.f32.mrb[0].mxu0 }
 0x11c   :  { %v671_v33 = vpop.f32.mrb[1].mxu0 }
 0x11d   :  { %v672_v35 = vadd.f32 %v671_v33, %v670_v32  ;;  %v673_v36 = vpop.f32.mrb[2].mxu0  ;;  %v720_v38 = vpop.f32.mrb[0].mxu1 }
 0x11e   :  { %v674_v37 = vpop.f32.mrb[3].mxu0  ;;  %v372_v41 = vpop.f32.mrb[1].mxu1 }
 0x11f   :  { %v675_v39 = vadd.f32 %v674_v37, %v673_v36  ;;  %v324_v40 = vadd.f32 %v672_v35, %v618_v34  ;;  %v721_v42 = vpop.f32.mrb[2].mxu1 }
 0x120   :  { %v375_v45 = vpop.f32.mrb[3].mxu1 }
 0x121   :  { %v948_v43 = vadd.f32 %v372_v41, %v324_v40  ;;  %v327_v44 = vadd.f32 %v675_v39, %v618_v34 }
 0x123   :  { %v950_v46 = vadd.f32 %v375_v45, %v327_v44  ;;  %v676_v47 = vpop.f32.mrb[4].mxu0  ;;  %v387_v49 = vmul.f32 %v948_v43, %v948_v43 }
 0x124   :  { %v677_v48 = vpop.f32.mrb[5].mxu0 }
 0x125   :  { %v388_v50 = vmul.f32 %v950_v46, %v950_v46  ;;  %v678_v51 = vadd.f32 %v677_v48, %v676_v47  ;;  %v679_v52 = vpop.f32.mrb[6].mxu0 }
 0x126   :  { %v680_v53 = vpop.f32.mrb[7].mxu0 }
 0x127   :  { %v742_v54 = vpack.c.bf16 %v388_v50, %v387_v49  ;;  %v332_v55 = vadd.f32 %v678_v51, %v618_v34  ;;  %v681_v56 = vadd.f32 %v680_v53, %v679_v52 }
 0x129   :  { %v956_v57 = vadd.f32 %v720_v38, %v332_v55  ;;  %v335_v58 = vadd.f32 %v681_v56, %v618_v34  ;;  %743 = vmatpush3.bf16.msra.mxu1 %v742_v54 }
 0x12a   :  { %744 = vmatprep.subr.bf16.mxu1 %v885_v30 }
 0x12b   :  { %v384_v59 = vadd.f32 %v721_v42, %v335_v58  ;;  %v389_v60 = vmul.f32 %v956_v57, %v956_v57 }
 0x12d   :  { %v390_v61 = vmul.f32 %v384_v59, %v384_v59 }
 0x12f   :  { %v745_v62 = vpack.c.bf16 %v390_v61, %v389_v60 }
 0x131   :  { %746 = vmatpush3.bf16.msra.mxu1 %v745_v62 }
 0x134   :  { %731 = vmatmul.mubr.msk.f32.vlgmr.msra.gmra.mrb[4].mxu1 %vm392_vm1, %v391_v63 }
 0x135   :  { %735 = vmatprep.mubr.msk.f32.mxu1 %vm470_vm2, %v466_v0 }
 0x207   :  { %v462_v1 = vpop.f32.mrb[4].mxu1 }
 0x208   :  { %v732_v3 = vpop.f32.mrb[5].mxu1  ;;  %733 = vmatprep.subr.mxu1 %v462_v1 }
 0x209   :  { %734 = vmatpush3.msra.mxu1 %v462_v1 }
 0x20a   :  { %736 = vmatmul.mubr.msk.f32.vlgmr.msra.gmra.mrb[6].mxu1 %vm470_vm2, %v467_v2 }
 0x20b   :  { %738 = vmatprep.mubr.msk.f32.mxu1 %vm470_vm2, %v468_v4 }
 0x20e   :  { %739 = vmatmul.mubr.msk.f32.gmra.mrb[8].mxu1 %vm470_vm2, %v469_v5 }
 0x2dd   :  { %v737_v6 = vpop.f32.mrb[6].mxu1 }
 0x2de   :  { %v569_v7 = vadd.f32 1e-09, %v737_v6  ;;  %v581_v8 = vadd.f32 1.0, %v737_v6  ;;  %v549_v9 = vpop.f32.mrb[7].mxu1 }
 0x2df   :  { %v568_v10 = vadd.f32 1e-09, %v549_v9  ;;  %v580_v11 = vadd.f32 1.0, %v549_v9 }
 0x2e0   :  { %791 = vrsqrt.f32 %v569_v7 }
 0x2e1   :  { %793 = vrcp.f32 %v581_v8  ;;  %v740_v12 = vpop.f32.mrb[8].mxu1 }
 0x2e2   :  { %795 = vrsqrt.f32 %v568_v10  ;;  %v571_v13 = vadd.f32 1e-09, %v740_v12  ;;  %v583_v14 = vadd.f32 1.0, %v740_v12  ;;  %v559_v15 = vpop.f32.mrb[9].mxu1 }
 0x2e3   :  { %797 = vrcp.f32 %v580_v11  ;;  %v570_v16 = vadd.f32 1e-09, %v559_v15  ;;  %v582_v17 = vadd.f32 1.0, %v559_v15 }
 0x2e4   :  { %799 = vrsqrt.f32 %v571_v13 }
 0x2e5   :  { %801 = vrcp.f32 %v583_v14 }
 0x2e6   :  { %803 = vrsqrt.f32 %v570_v16 }
 0x2e7   :  { %805 = vrcp.f32 %v582_v17 }
 0x2ea   :  { %v792_v18 = vpop.eup %791 }
 0x2eb   :  { %v794_v19 = vpop.eup %793  ;;  %v577_v20 = vmul.f32 %v792_v18, %v737_v6 }
 0x2ec   :  { %v796_v21 = vpop.eup %795 }
 0x2ed   :  { %v798_v22 = vpop.eup %797  ;;  %v589_v23 = vmul.f32 %v794_v19, %v577_v20  ;;  %v576_v24 = vmul.f32 %v796_v21, %v549_v9 }
 0x2ee   :  { %v800_v25 = vpop.eup %799 }
 0x2ef   :  { %v802_v26 = vpop.eup %801  ;;  %v593_v27 = vmul.f32 %v589_v23, %v950_v46  ;;  %v588_v28 = vmul.f32 %v798_v22, %v576_v24  ;;  %v579_v29 = vmul.f32 %v800_v25, %v740_v12 }
 0x2f0   :  { %v804_v30 = vpop.eup %803 }
 0x2f1   :  { %597 = vst [vmem:[#allocation7 + $0x8] sm:$0xff] %v593_v27  ;;  %v592_v31 = vmul.f32 %v588_v28, %v948_v43  ;;  %v591_v32 = vmul.f32 %v802_v26, %v579_v29  ;;  %v578_v33 = vmul.f32 %v804_v30, %v559_v15  ;;  %v806_v34 = vpop.eup %805 }
 0x2f3   :  { %596 = vst [vmem:[#allocation7] sm:$0xff] %v592_v31  ;;  %v595_v35 = vmul.f32 %v591_v32, %v384_v59  ;;  %v590_v36 = vmul.f32 %v806_v34, %v578_v33 }
 0x2f5   :  { %599 = vst [vmem:[#allocation7 + $0x18] sm:$0xff] %v595_v35  ;;  %v594_v37 = vmul.f32 %v590_v36, %v956_v57 }
 0x2f7   :  { %598 = vst [vmem:[#allocation7 + $0x10] sm:$0xff] %v594_v37 }
 0x2f8   :  { %862 = shalt.err (!%p859_p6)
}
 0x2f9   :  { %s863_s8 = scalar_lea.hbm %s995_s5, 512 }
 0x2fa   :  { %p864_p7 = scmp.ne.s32.totalorder %s995_s5, %s863_s8  ;;  %p867_p8 = scmp.lt.u32.totalorder %s863_s8, %s995_s5 }
 0x2fc   :  { %p869_p9 = pnand %p867_p8, %p864_p7 }
 0x2fe   :  { %872 = shalt.err (!%p869_p9)
}
 0x2ff   :  { %s889_s13 = smov 128   ;;  %s890_s14 = smov 8  }
 0x300   :  { %611 = dma.vmem_to_hbm [thread:$0]  %s606_s29, 512, %s995_s5, [#allocation4], %s889_s13, %s889_s13, %s890_s14  }
 0x301   :  { %877 = dma.done.wait [#allocation4], 512  }
 0x302   :  { %878 = vsyncadd [#allocation4], 4294966784 }
 0x303   :  { %615 = vsyncpa [#allocation3], 1 }
 0x304   :  { %616 = vsyncpa [#allocation6], 1 }
 0x305   :  { %617 = vsyncpa [#allocation4], 1 }

</bundles_post_ra>
